<compile_context>
chip_gen: v7x
topology: tpu7x:2x2x1
jax: 0.10.0
libtpu: 0.0.40
codegen_flags: <defaults>
</compile_context>

<pallas_src>
import functools
import math

import jax
import jax.numpy as jnp
from jax.experimental import pallas as pl
from jax.experimental.pallas import tpu as pltpu


# ----------------------------- helpers ---------------------------------------

def _round_up(n, m):
    return ((n + m - 1) // m) * m


def _pad_last2(a, rows, cols):
    pad = [(0, 0)] * (a.ndim - 2) + [(0, rows - a.shape[-2]),
                                     (0, cols - a.shape[-1])]
    return jnp.pad(a, pad)


def _num_tensorcores():
    """2 TCs per chip on v7x, 1 on v5e/v6e. Defensive default of 1."""
    try:
        kind = jax.devices()[0].device_kind.lower()
        return 2 if "v7" in kind else 1
    except Exception:  # pragma: no cover
        return 1


# ----------------------------- kernel ----------------------------------------

def _linear_ln_gelu(x, w, b, n_valid):
    """Linear -> LayerNorm(elementwise_affine=False, eps=1e-5) -> exact GELU.

    Works on lane-padded tensors: the padded output lanes of `w`/`b` are zero,
    so sum / sum-of-squares over all lanes equal the sums over the `n_valid`
    real lanes. Garbage in padded lanes after LN is annihilated by the
    zero-padded input rows of the next weight matrix.
    """
    y = jnp.dot(x.astype(w.dtype), w, preferred_element_type=jnp.float32) + b
    inv_n = 1.0 / n_valid
    s1 = jnp.sum(y, axis=-1, keepdims=True)
    s2 = jnp.sum(y * y, axis=-1, keepdims=True)
    mu = s1 * inv_n
    var = jnp.maximum(s2 * inv_n - mu * mu, 0.0)
    yn = (y - mu) * jax.lax.rsqrt(var + 1e-5)
    # PyTorch nn.GELU() default is the exact (erf-based) formulation.
    return 0.5 * yn * (1.0 + jax.lax.erf(yn * (1.0 / math.sqrt(2.0))))


def energy_kernel(num_seq_layers, h_dim,
                  x_ref, w0_ref, b0_ref, ws_ref, bs_ref, wh_ref, bh_ref,
                  out_ref):
    # x2h
    h = _linear_ln_gelu(x_ref[...], w0_ref[...], b0_ref[...], h_dim)
    # seq_nn: (num_h_layers - 1) stacked LinearReLU blocks (static unroll).
    # TODO(synk): switch to lax.fori_loop over ws_ref[i]/bs_ref[i] if
    # num_seq_layers grows large enough for vreg pressure to matter.
    for i in range(num_seq_layers):
        h = _linear_ln_gelu(h, ws_ref[i], bs_ref[i], h_dim)
    # fused head: [h2e | h2logvar], lane-padded to 128 -> one dense store
    out = jnp.dot(h.astype(wh_ref.dtype), wh_ref[...],
                  preferred_element_type=jnp.float32) + bh_ref[...]
    out_ref[...] = out.astype(out_ref.dtype)


# ----------------------------- one-time param prep ----------------------------

def prepare_params(params, *, matmul_dtype=jnp.bfloat16):
    """Pad / concat / cast the weights ONCE (keep out of the per-call path).

    Returns (prepped, meta). Weights are lane-padded to multiples of 128 on
    the output dim; the two heads are fused into one (h_pad, 128) matmul.
    x keeps its original feature dim (w0 keeps its real input dim).
    """
    w0, b0 = params["w0"], params["b0"]
    ws, bs = params["ws"], params["bs"]
    we, be = params["we"], params["be"]
    wlv, blv = params["wlv"], params["blv"]

    x_dim, h_dim = w0.shape
    L = ws.shape[0]
    z_dim = wlv.shape[1]
    h_pad = _round_up(h_dim, 128)
    out_dim = 2 + z_dim
    out_pad = _round_up(out_dim, 128)

    prepped = {
        "w0": _pad_last2(w0, x_dim, h_pad).astype(matmul_dtype),
        "b0": _pad_last2(b0, 1, h_pad),
        "ws": _pad_last2(ws, h_pad, h_pad).astype(matmul_dtype),
        "bs": _pad_last2(bs, 1, h_pad),
        "wh": _pad_last2(jnp.concatenate([we, wlv], axis=1),
                         h_pad, out_pad).astype(matmul_dtype),
        "bh": _pad_last2(jnp.concatenate([be, blv], axis=1), 1, out_pad),
    }
    prepped = jax.tree_util.tree_map(jax.block_until_ready, prepped)
    meta = dict(x_dim=x_dim, h_dim=h_dim, z_dim=z_dim, L=L,
                h_pad=h_pad, out_pad=out_pad)
    return prepped, meta


# ----------------------------- wrapper ----------------------------------------

def energy_forward(x, prepped, meta, *, b_tile_max=512):
    """Run the fused Energy forward. `prepped`/`meta` come from prepare_params."""
    B, x_dim = x.shape
    assert x_dim == meta["x_dim"]
    h_dim, z_dim, L = meta["h_dim"], meta["z_dim"], meta["L"]
    h_pad, out_pad = meta["h_pad"], meta["out_pad"]

    w0p, b0p = prepped["w0"], prepped["b0"]
    wsp, bsp = prepped["ws"], prepped["bs"]
    whp, bhp = prepped["wh"], prepped["bh"]

    # Batch tiling: single fat step on 1-TC chips; >=2 parallel steps on v7x
    # (2 TCs); big tiles (<=512 rows) amortize the ~0.35us per-step cost.
    n_tc = _num_tensorcores()
    n_steps = max(n_tc, pl.cdiv(B, b_tile_max))
    if n_steps == 1:
        b_tile = B
    else:
        b_tile = min(b_tile_max, _round_up(pl.cdiv(B, n_steps), 8))
    B_pad = _round_up(B, b_tile)
    grid = (B_pad // b_tile,)

    xb = jnp.pad(x, ((0, B_pad - B), (0, 0))) if B_pad > B else x

    # Constant weights: unblocked, resident in VMEM once (no double buffering,
    # no per-step re-DMA).
    w_spec = pl.BlockSpec(memory_space=pltpu.MemorySpace.VMEM)

    # VMEM budget: resident weights + double-buffered io tiles + activations.
    # TODO(synk): for production h_dim where resident weights exceed ~half of
    # v7x's 64 MiB VMEM, stream ws layer-by-layer (emit_pipeline over L).
    bytes_weights = sum(int(a.size) * a.dtype.itemsize
                        for a in (w0p, b0p, wsp, bsp, whp, bhp))
    io_bytes = 2 * (b_tile * x_dim * 4 + b_tile * out_pad * 4)
    act_bytes = 4 * b_tile * h_pad * 4
    vmem_limit = int(max(32 << 20,
                         min(bytes_weights + io_bytes + act_bytes + (8 << 20),
                             128 << 20)))

    cost = pl.CostEstimate(
        flops=2 * B_pad * (x_dim * h_pad + L * h_pad * h_pad + h_pad * out_pad),
        transcendentals=B_pad * h_pad * (L + 1),
        bytes_accessed=B_pad * x_dim * 4 + B_pad * out_pad * 4 + bytes_weights,
    )

    kern = functools.partial(energy_kernel, L, h_dim)

    out = pl.pallas_call(
        kern,
        out_shape=jax.ShapeDtypeStruct((B_pad, out_pad), jnp.float32),
        grid=grid,
        in_specs=[
            pl.BlockSpec((b_tile, x_dim), lambda i: (i, 0)),   # x tile (unpadded lanes)
            w_spec,  # w0
            w_spec,  # b0
            w_spec,  # ws (stacked seq weights)
            w_spec,  # bs
            w_spec,  # fused head weight
            w_spec,  # fused head bias
        ],
        out_specs=pl.BlockSpec((b_tile, out_pad), lambda i: (i, 0)),
        compiler_params=pltpu.CompilerParams(
            dimension_semantics=("parallel",),
            vmem_limit_bytes=vmem_limit),
        cost_estimate=cost,
    )(xb, w0p, b0p, wsp, bsp, whp, bhp)

    e = out[:B, 0]                     # PyTorch: self.h2e(post_h)[:, 0]
    logvar = out[:B, 2:2 + z_dim]      # PyTorch: self.h2logvar(post_h)
    return e, logvar


# ----------------------------- reference & init -------------------------------

def energy_reference(x, params):
    """Pure-JAX reference (unpadded) for correctness check."""
    def lrg(h, w, b):
        y = h @ w + b
        mu = jnp.mean(y, axis=-1, keepdims=True)
        var = jnp.mean((y - mu) ** 2, axis=-1, keepdims=True)
        yn = (y - mu) / jnp.sqrt(var + 1e-5)
        return jax.nn.gelu(yn, approximate=False)

    h = lrg(x, params["w0"], params["b0"])
    for i in range(params["ws"].shape[0]):
        h = lrg(h, params["ws"][i], params["bs"][i])
    e2 = h @ params["we"] + params["be"]
    lv = h @ params["wlv"] + params["blv"]
    return e2[:, 0], lv


def init_params(key, num_h_layers, x_dim, h_dim, z_dim):
    """Deterministic init mimicking torch.nn.Linear defaults U(-1/sqrt(in), 1/sqrt(in))."""
    def linear(key, fan_in, fan_out):
        kw, kb = jax.random.split(key)
        bound = 1.0 / math.sqrt(fan_in)
        w = jax.random.uniform(kw, (fan_in, fan_out), jnp.float32, -bound, bound)
        b = jax.random.uniform(kb, (1, fan_out), jnp.float32, -bound, bound)
        return w, b

    L = num_h_layers - 1
    keys = jax.random.split(key, 3 + L)
    w0, b0 = linear(keys[0], x_dim, h_dim)
    ws, bs = [], []
    for i in range(L):
        w, b = linear(keys[1 + i], h_dim, h_dim)
        ws.append(w); bs.append(b)
    we, be = linear(keys[1 + L], h_dim, 2)
    wlv, blv = linear(keys[2 + L], h_dim, z_dim)
    return {
        "w0": w0, "b0": b0,
        "ws": jnp.stack(ws, axis=0), "bs": jnp.stack(bs, axis=0),
        "we": we, "be": be, "wlv": wlv, "blv": blv,
    }


# ----------------------------- main --------------------------------------------

if __name__ == "__main__":
    num_h_layers = 3   # seq_nn has num_h_layers - 1 = 2 LinearReLU blocks
    x_dim, h_dim, z_dim = 32, 32, 16
    batch = 16

    key = jax.random.PRNGKey(0)
    kx, kp = jax.random.split(key)
    x = jax.random.normal(kx, (batch, x_dim), jnp.float32)
    params = init_params(kp, num_h_layers, x_dim, h_dim, z_dim)
    e_ref, lv_ref = energy_reference(x, params)

    # Default / recommended path: bf16 MXU operands (f32 accumulation and
    # f32 LN/GELU math) — bf16-native on v5e/v6e/v7x MXUs.
    prep_bf16, meta = prepare_params(params, matmul_dtype=jnp.bfloat16)
    e, logvar = energy_forward(x, prep_bf16, meta)
    e = jax.block_until_ready(e)
    logvar = jax.block_until_ready(logvar)
    assert e.shape == (batch,) and logvar.shape == (batch, z_dim)
    assert jnp.allclose(e, e_ref, atol=5e-2, rtol=5e-2)
    assert jnp.allclose(logvar, lv_ref, atol=5e-2, rtol=5e-2)

    # Exactness check of the kernel math itself with f32 operands.
    prep_f32, meta32 = prepare_params(params, matmul_dtype=jnp.float32)
    e32, lv32 = energy_forward(x, prep_f32, meta32)
    e32 = jax.block_until_ready(e32)
    lv32 = jax.block_until_ready(lv32)
    assert jnp.allclose(e32, e_ref, atol=1e-4, rtol=1e-4)
    assert jnp.allclose(lv32, lv_ref, atol=1e-4, rtol=1e-4)

    print("KERNEL_OK")
</pallas_src>

<mosaic_0001>
module attributes {stable_mosaic.version = 11 : i64} {
  func.func @energy_kernel(%arg0: i32, %arg1: memref<16x32xf32, #tpu.memory_space<vmem>>, %arg2: memref<32x128xbf16, #tpu.memory_space<vmem>>, %arg3: memref<1x128xf32, #tpu.memory_space<vmem>>, %arg4: memref<2x128x128xbf16, #tpu.memory_space<vmem>>, %arg5: memref<2x1x128xf32, #tpu.memory_space<vmem>>, %arg6: memref<128x128xbf16, #tpu.memory_space<vmem>>, %arg7: memref<1x128xf32, #tpu.memory_space<vmem>>, %arg8: memref<16x128xf32, #tpu.memory_space<vmem>>) attributes {dimension_semantics = [#tpu.dimension_semantics<parallel>], iteration_bounds = array<i64: 1>, scalar_prefetch = 0 : i64, scratch_operands = 0 : i64, tpu.core_type = #tpu.core_type<tc>, window_params = [{transform_indices = @transform_0, window_bounds = array<i64: 16, 32>}, {pipeline_mode = #tpu.pipeline_mode<synchronous>, transform_indices = @transform_1, window_bounds = array<i64: 32, 128>}, {pipeline_mode = #tpu.pipeline_mode<synchronous>, transform_indices = @transform_2, window_bounds = array<i64: 1, 128>}, {pipeline_mode = #tpu.pipeline_mode<synchronous>, transform_indices = @transform_3, window_bounds = array<i64: 2, 128, 128>}, {pipeline_mode = #tpu.pipeline_mode<synchronous>, transform_indices = @transform_4, window_bounds = array<i64: 2, 1, 128>}, {pipeline_mode = #tpu.pipeline_mode<synchronous>, transform_indices = @transform_5, window_bounds = array<i64: 128, 128>}, {pipeline_mode = #tpu.pipeline_mode<synchronous>, transform_indices = @transform_6, window_bounds = array<i64: 1, 128>}, {transform_indices = @transform_7, window_bounds = array<i64: 16, 128>}]} {
    %c0 = arith.constant 0 : index
    %c0_0 = arith.constant 0 : index
    %0 = vector.load %arg1[%c0, %c0_0] : memref<16x32xf32, #tpu.memory_space<vmem>>, vector<16x32xf32>
    %c0_1 = arith.constant 0 : index
    %c0_2 = arith.constant 0 : index
    %1 = vector.load %arg2[%c0_1, %c0_2] : memref<32x128xbf16, #tpu.memory_space<vmem>>, vector<32x128xbf16>
    %c0_3 = arith.constant 0 : index
    %c0_4 = arith.constant 0 : index
    %2 = vector.load %arg3[%c0_3, %c0_4] : memref<1x128xf32, #tpu.memory_space<vmem>>, vector<1x128xf32>
    %3 = arith.truncf %0 : vector<16x32xf32> to vector<16x32xbf16>
    %cst = arith.constant dense<0.000000e+00> : vector<16x128xf32>
    %4 = tpu.matmul %3, %1, %cst {dimension_numbers = #tpu.dot_dimension_numbers<[1], [0], [0], [1], [0, 0, 1, 1], [], []>} : vector<16x32xbf16>, vector<32x128xbf16>, vector<16x128xf32> -> vector<16x128xf32>
    %5 = vector.broadcast %2 : vector<1x128xf32> to vector<16x128xf32>
    %6 = arith.addf %4, %5 : vector<16x128xf32>
    %cst_5 = arith.constant dense<0.000000e+00> : vector<16xf32>
    %7 = vector.multi_reduction <add>, %6, %cst_5 [1] : vector<16x128xf32> to vector<16xf32>
    %8 = vector.shape_cast %7 : vector<16xf32> to vector<16x1xf32>
    %9 = arith.mulf %6, %6 : vector<16x128xf32>
    %cst_6 = arith.constant dense<0.000000e+00> : vector<16xf32>
    %10 = vector.multi_reduction <add>, %9, %cst_6 [1] : vector<16x128xf32> to vector<16xf32>
    %11 = vector.shape_cast %10 : vector<16xf32> to vector<16x1xf32>
    %cst_7 = arith.constant 3.125000e-02 : f32
    %12 = vector.broadcast %cst_7 : f32 to vector<16x1xf32>
    %13 = arith.mulf %8, %12 : vector<16x1xf32>
    %cst_8 = arith.constant 3.125000e-02 : f32
    %14 = vector.broadcast %cst_8 : f32 to vector<16x1xf32>
    %15 = arith.mulf %11, %14 : vector<16x1xf32>
    %16 = arith.mulf %13, %13 : vector<16x1xf32>
    %17 = arith.subf %15, %16 : vector<16x1xf32>
    %cst_9 = arith.constant 0.000000e+00 : f32
    %18 = vector.broadcast %cst_9 : f32 to vector<16x1xf32>
    %19 = arith.maximumf %17, %18 : vector<16x1xf32>
    %20 = vector.broadcast %13 : vector<16x1xf32> to vector<16x128xf32>
    %21 = arith.subf %6, %20 : vector<16x128xf32>
    %cst_10 = arith.constant 9.99999974E-6 : f32
    %22 = vector.broadcast %cst_10 : f32 to vector<16x1xf32>
    %23 = arith.addf %19, %22 : vector<16x1xf32>
    %24 = math.rsqrt %23 : vector<16x1xf32>
    %25 = vector.broadcast %24 : vector<16x1xf32> to vector<16x128xf32>
    %26 = arith.mulf %21, %25 : vector<16x128xf32>
    %cst_11 = arith.constant 5.000000e-01 : f32
    %27 = vector.broadcast %cst_11 : f32 to vector<16x128xf32>
    %28 = arith.mulf %27, %26 : vector<16x128xf32>
    %cst_12 = arith.constant 0.707106769 : f32
    %29 = vector.broadcast %cst_12 : f32 to vector<16x128xf32>
    %30 = arith.mulf %26, %29 : vector<16x128xf32>
    %31 = math.erf %30 : vector<16x128xf32>
    %cst_13 = arith.constant 1.000000e+00 : f32
    %32 = vector.broadcast %cst_13 : f32 to vector<16x128xf32>
    %33 = arith.addf %32, %31 : vector<16x128xf32>
    %34 = arith.mulf %28, %33 : vector<16x128xf32>
    %c0_14 = arith.constant 0 : index
    %c0_15 = arith.constant 0 : index
    %c0_16 = arith.constant 0 : index
    %35 = vector.load %arg4[%c0_14, %c0_15, %c0_16] : memref<2x128x128xbf16, #tpu.memory_space<vmem>>, vector<1x128x128xbf16>
    %36 = vector.shape_cast %35 : vector<1x128x128xbf16> to vector<128x128xbf16>
    %c0_17 = arith.constant 0 : index
    %c0_18 = arith.constant 0 : index
    %c0_19 = arith.constant 0 : index
    %37 = vector.load %arg5[%c0_17, %c0_18, %c0_19] : memref<2x1x128xf32, #tpu.memory_space<vmem>>, vector<1x1x128xf32>
    %38 = vector.shape_cast %37 : vector<1x1x128xf32> to vector<1x128xf32>
    %39 = arith.truncf %34 : vector<16x128xf32> to vector<16x128xbf16>
    %cst_20 = arith.constant dense<0.000000e+00> : vector<16x128xf32>
    %40 = tpu.matmul %39, %36, %cst_20 {dimension_numbers = #tpu.dot_dimension_numbers<[1], [0], [0], [1], [0, 0, 1, 1], [], []>} : vector<16x128xbf16>, vector<128x128xbf16>, vector<16x128xf32> -> vector<16x128xf32>
    %41 = vector.broadcast %38 : vector<1x128xf32> to vector<16x128xf32>
    %42 = arith.addf %40, %41 : vector<16x128xf32>
    %cst_21 = arith.constant dense<0.000000e+00> : vector<16xf32>
    %43 = vector.multi_reduction <add>, %42, %cst_21 [1] : vector<16x128xf32> to vector<16xf32>
    %44 = vector.shape_cast %43 : vector<16xf32> to vector<16x1xf32>
    %45 = arith.mulf %42, %42 : vector<16x128xf32>
    %cst_22 = arith.constant dense<0.000000e+00> : vector<16xf32>
    %46 = vector.multi_reduction <add>, %45, %cst_22 [1] : vector<16x128xf32> to vector<16xf32>
    %47 = vector.shape_cast %46 : vector<16xf32> to vector<16x1xf32>
    %cst_23 = arith.constant 3.125000e-02 : f32
    %48 = vector.broadcast %cst_23 : f32 to vector<16x1xf32>
    %49 = arith.mulf %44, %48 : vector<16x1xf32>
    %cst_24 = arith.constant 3.125000e-02 : f32
    %50 = vector.broadcast %cst_24 : f32 to vector<16x1xf32>
    %51 = arith.mulf %47, %50 : vector<16x1xf32>
    %52 = arith.mulf %49, %49 : vector<16x1xf32>
    %53 = arith.subf %51, %52 : vector<16x1xf32>
    %cst_25 = arith.constant 0.000000e+00 : f32
    %54 = vector.broadcast %cst_25 : f32 to vector<16x1xf32>
    %55 = arith.maximumf %53, %54 : vector<16x1xf32>
    %56 = vector.broadcast %49 : vector<16x1xf32> to vector<16x128xf32>
    %57 = arith.subf %42, %56 : vector<16x128xf32>
    %cst_26 = arith.constant 9.99999974E-6 : f32
    %58 = vector.broadcast %cst_26 : f32 to vector<16x1xf32>
    %59 = arith.addf %55, %58 : vector<16x1xf32>
    %60 = math.rsqrt %59 : vector<16x1xf32>
    %61 = vector.broadcast %60 : vector<16x1xf32> to vector<16x128xf32>
    %62 = arith.mulf %57, %61 : vector<16x128xf32>
    %cst_27 = arith.constant 5.000000e-01 : f32
    %63 = vector.broadcast %cst_27 : f32 to vector<16x128xf32>
    %64 = arith.mulf %63, %62 : vector<16x128xf32>
    %cst_28 = arith.constant 0.707106769 : f32
    %65 = vector.broadcast %cst_28 : f32 to vector<16x128xf32>
    %66 = arith.mulf %62, %65 : vector<16x128xf32>
    %67 = math.erf %66 : vector<16x128xf32>
    %cst_29 = arith.constant 1.000000e+00 : f32
    %68 = vector.broadcast %cst_29 : f32 to vector<16x128xf32>
    %69 = arith.addf %68, %67 : vector<16x128xf32>
    %70 = arith.mulf %64, %69 : vector<16x128xf32>
    %c1 = arith.constant 1 : index
    %c0_30 = arith.constant 0 : index
    %c0_31 = arith.constant 0 : index
    %71 = vector.load %arg4[%c1, %c0_30, %c0_31] : memref<2x128x128xbf16, #tpu.memory_space<vmem>>, vector<1x128x128xbf16>
    %72 = vector.shape_cast %71 : vector<1x128x128xbf16> to vector<128x128xbf16>
    %c1_32 = arith.constant 1 : index
    %c0_33 = arith.constant 0 : index
    %c0_34 = arith.constant 0 : index
    %73 = vector.load %arg5[%c1_32, %c0_33, %c0_34] : memref<2x1x128xf32, #tpu.memory_space<vmem>>, vector<1x1x128xf32>
    %74 = vector.shape_cast %73 : vector<1x1x128xf32> to vector<1x128xf32>
    %75 = arith.truncf %70 : vector<16x128xf32> to vector<16x128xbf16>
    %cst_35 = arith.constant dense<0.000000e+00> : vector<16x128xf32>
    %76 = tpu.matmul %75, %72, %cst_35 {dimension_numbers = #tpu.dot_dimension_numbers<[1], [0], [0], [1], [0, 0, 1, 1], [], []>} : vector<16x128xbf16>, vector<128x128xbf16>, vector<16x128xf32> -> vector<16x128xf32>
    %77 = vector.broadcast %74 : vector<1x128xf32> to vector<16x128xf32>
    %78 = arith.addf %76, %77 : vector<16x128xf32>
    %cst_36 = arith.constant dense<0.000000e+00> : vector<16xf32>
    %79 = vector.multi_reduction <add>, %78, %cst_36 [1] : vector<16x128xf32> to vector<16xf32>
    %80 = vector.shape_cast %79 : vector<16xf32> to vector<16x1xf32>
    %81 = arith.mulf %78, %78 : vector<16x128xf32>
    %cst_37 = arith.constant dense<0.000000e+00> : vector<16xf32>
    %82 = vector.multi_reduction <add>, %81, %cst_37 [1] : vector<16x128xf32> to vector<16xf32>
    %83 = vector.shape_cast %82 : vector<16xf32> to vector<16x1xf32>
    %cst_38 = arith.constant 3.125000e-02 : f32
    %84 = vector.broadcast %cst_38 : f32 to vector<16x1xf32>
    %85 = arith.mulf %80, %84 : vector<16x1xf32>
    %cst_39 = arith.constant 3.125000e-02 : f32
    %86 = vector.broadcast %cst_39 : f32 to vector<16x1xf32>
    %87 = arith.mulf %83, %86 : vector<16x1xf32>
    %88 = arith.mulf %85, %85 : vector<16x1xf32>
    %89 = arith.subf %87, %88 : vector<16x1xf32>
    %cst_40 = arith.constant 0.000000e+00 : f32
    %90 = vector.broadcast %cst_40 : f32 to vector<16x1xf32>
    %91 = arith.maximumf %89, %90 : vector<16x1xf32>
    %92 = vector.broadcast %85 : vector<16x1xf32> to vector<16x128xf32>
    %93 = arith.subf %78, %92 : vector<16x128xf32>
    %cst_41 = arith.constant 9.99999974E-6 : f32
    %94 = vector.broadcast %cst_41 : f32 to vector<16x1xf32>
    %95 = arith.addf %91, %94 : vector<16x1xf32>
    %96 = math.rsqrt %95 : vector<16x1xf32>
    %97 = vector.broadcast %96 : vector<16x1xf32> to vector<16x128xf32>
    %98 = arith.mulf %93, %97 : vector<16x128xf32>
    %cst_42 = arith.constant 5.000000e-01 : f32
    %99 = vector.broadcast %cst_42 : f32 to vector<16x128xf32>
    %100 = arith.mulf %99, %98 : vector<16x128xf32>
    %cst_43 = arith.constant 0.707106769 : f32
    %101 = vector.broadcast %cst_43 : f32 to vector<16x128xf32>
    %102 = arith.mulf %98, %101 : vector<16x128xf32>
    %103 = math.erf %102 : vector<16x128xf32>
    %cst_44 = arith.constant 1.000000e+00 : f32
    %104 = vector.broadcast %cst_44 : f32 to vector<16x128xf32>
    %105 = arith.addf %104, %103 : vector<16x128xf32>
    %106 = arith.mulf %100, %105 : vector<16x128xf32>
    %107 = arith.truncf %106 : vector<16x128xf32> to vector<16x128xbf16>
    %c0_45 = arith.constant 0 : index
    %c0_46 = arith.constant 0 : index
    %108 = vector.load %arg6[%c0_45, %c0_46] : memref<128x128xbf16, #tpu.memory_space<vmem>>, vector<128x128xbf16>
    %cst_47 = arith.constant dense<0.000000e+00> : vector<16x128xf32>
    %109 = tpu.matmul %107, %108, %cst_47 {dimension_numbers = #tpu.dot_dimension_numbers<[1], [0], [0], [1], [0, 0, 1, 1], [], []>} : vector<16x128xbf16>, vector<128x128xbf16>, vector<16x128xf32> -> vector<16x128xf32>
    %c0_48 = arith.constant 0 : index
    %c0_49 = arith.constant 0 : index
    %110 = vector.load %arg7[%c0_48, %c0_49] : memref<1x128xf32, #tpu.memory_space<vmem>>, vector<1x128xf32>
    %111 = vector.broadcast %110 : vector<1x128xf32> to vector<16x128xf32>
    %112 = arith.addf %109, %111 : vector<16x128xf32>
    %c0_50 = arith.constant 0 : index
    %c0_51 = arith.constant 0 : index
    %113 = vector.load %arg8[%c0_50, %c0_51] : memref<16x128xf32, #tpu.memory_space<vmem>>, vector<16x128xf32>
    tpu.vector_store %arg8[%c0_50, %c0_51], %112 {strides = array<i32>} : memref<16x128xf32, #tpu.memory_space<vmem>>, vector<16x128xf32>,
    return
  }
  func.func @transform_0(%arg0: i32) -> (i32, i32) {
    %c0_i32 = arith.constant 0 : i32
    %c0_i32_0 = arith.constant 0 : i32
    return %arg0, %c0_i32 : i32, i32
  }
  func.func @transform_1(%arg0: i32) -> (i32, i32) {
    %c0_i32 = arith.constant 0 : i32
    %c0_i32_0 = arith.constant 0 : i32
    %c0_i32_1 = arith.constant 0 : i32
    return %c0_i32, %c0_i32_0 : i32, i32
  }
  func.func @transform_2(%arg0: i32) -> (i32, i32) {
    %c0_i32 = arith.constant 0 : i32
    %c0_i32_0 = arith.constant 0 : i32
    %c0_i32_1 = arith.constant 0 : i32
    return %c0_i32, %c0_i32_0 : i32, i32
  }
  func.func @transform_3(%arg0: i32) -> (i32, i32, i32) {
    %c0_i32 = arith.constant 0 : i32
    %c0_i32_0 = arith.constant 0 : i32
    %c0_i32_1 = arith.constant 0 : i32
    %c0_i32_2 = arith.constant 0 : i32
    return %c0_i32, %c0_i32_0, %c0_i32_1 : i32, i32, i32
  }
  func.func @transform_4(%arg0: i32) -> (i32, i32, i32) {
    %c0_i32 = arith.constant 0 : i32
    %c0_i32_0 = arith.constant 0 : i32
    %c0_i32_1 = arith.constant 0 : i32
    %c0_i32_2 = arith.constant 0 : i32
    return %c0_i32, %c0_i32_0, %c0_i32_1 : i32, i32, i32
  }
  func.func @transform_5(%arg0: i32) -> (i32, i32) {
    %c0_i32 = arith.constant 0 : i32
    %c0_i32_0 = arith.constant 0 : i32
    %c0_i32_1 = arith.constant 0 : i32
    return %c0_i32, %c0_i32_0 : i32, i32
  }
  func.func @transform_6(%arg0: i32) -> (i32, i32) {
    %c0_i32 = arith.constant 0 : i32
    %c0_i32_0 = arith.constant 0 : i32
    %c0_i32_1 = arith.constant 0 : i32
    return %c0_i32, %c0_i32_0 : i32, i32
  }
  func.func @transform_7(%arg0: i32) -> (i32, i32) {
    %c0_i32 = arith.constant 0 : i32
    %c0_i32_0 = arith.constant 0 : i32
    return %arg0, %c0_i32 : i32, i32
  }
}

</mosaic_0001>

<bundles_post_ra>
// kernel: tpu_custom_call.1
= control target key start
LH: loop header
LB: loop body
LE: loop exit
PB: predicated region body
PF: predicated region fallthrough
CT: control target
= control target key end

     0   :  { %12 = vsyncpa [#allocation3], 0  ;;  %s1118_s0 = inlined_call_operand.hbm [shape: f32[16,32], index: 0, kind: input, shape index: {}]   ;;  %s1119_s1 = inlined_call_operand.hbm [shape: bf16[32,128], index: 1, kind: input, shape index: {}]   ;;  %s1120_s2 = inlined_call_operand.vmem [shape: f32[1,128], index: 2, kind: input, shape index: {}]   ;;  %s1121_s3 = inlined_call_operand.hbm [shape: bf16[2,128,128], index: 3, kind: input, shape index: {}]   ;;  %s1122_s4 = inlined_call_operand.vmem [shape: f32[2,1,128], index: 4, kind: input, shape index: {}]   ;;  %s1123_s5 = inlined_call_operand.hbm [shape: bf16[128,128], index: 5, kind: input, shape index: {}]   ;;  %s1124_s6 = inlined_call_operand.vmem [shape: f32[1,128], index: 6, kind: input, shape index: {}]   ;;  %s1125_s7 = inlined_call_operand.hbm [shape: f32[16,128], index: 7, kind: output, shape index: {}]  }
   0x1   :  { %13 = vsyncpa [#allocation6], 0 }
   0x2   :  { %14 = vsyncpa [#allocation9], 0 }
   0x3   :  { %15 = vsyncpa [#allocation4], 0  ;;  %s939_s24 = smov [#allocation5]   ;;  %s821_s28 = scalar_lea.hbm %s1119_s1, 256 }
   0x4   :  { %s33_s25 = sshll.u32 %s939_s24, 4  ;;  %p822_p0 = scmp.ne.s32.totalorder %s1119_s1, %s821_s28  ;;  %s34_s25 = int_to_ptr.vmem [resolvable:$true] %s33_s25 }
   0x5   :  { %p825_p1 = scmp.lt.u32.totalorder %s821_s28, %s1119_s1 }
   0x7   :  { %p827_p2 = pnand %p825_p1, %p822_p0 }
   0x9   :  { %830 = shalt.err (!%p827_p2)
}
   0xa   :  { %s831_s10 = scalar_lea.vmem %s34_s25, 256  ;;  %p836_p4 = scmp.lt.s32.totalorder %s34_s25, %s34_s25 }
   0xb   :  { %p832_p3 = scmp.ne.s32.totalorder %s34_s25, %s831_s10  ;;  %p837_p5 = scmp.lt.s32.totalorder %s831_s10, %s831_s10 }
   0xd   :  { %p838_p6 = por %p837_p5, %p836_p4 }
   0xf   :  { %p839_p7 = pnand %p838_p6, %p832_p3 }
  0x11   :  { %842 = shalt.err (!%p839_p7)
}
  0x12   :  { %s940_s11 = smov 64   ;;  %s941_s12 = smov 4  }
  0x13   :  { %39 = dma.hbm_to_vmem [thread:$0]  %s1119_s1, 256, %s34_s25, [#allocation6], %s940_s11, %s940_s11, %s941_s12  }
  0x14   :  { %s942_s15 = smov [#allocation2]   ;;  %s843_s19 = scalar_lea.hbm %s1118_s0, 256 }
  0x15   :  { %s21_s16 = sshll.u32 %s942_s15, 4  ;;  %p844_p8 = scmp.ne.s32.totalorder %s1118_s0, %s843_s19  ;;  %s22_s16 = int_to_ptr.vmem [resolvable:$true] %s21_s16 }
  0x16   :  { %p847_p9 = scmp.lt.u32.totalorder %s843_s19, %s1118_s0 }
  0x18   :  { %p849_p10 = pnand %p847_p9, %p844_p8 }
  0x1a   :  { %852 = shalt.err (!%p849_p10)
}
  0x1b   :  { %s853_s24 = scalar_lea.vmem %s22_s16, 256  ;;  %p858_p12 = scmp.lt.s32.totalorder %s22_s16, %s22_s16 }
  0x1c   :  { %p854_p11 = scmp.ne.s32.totalorder %s22_s16, %s853_s24  ;;  %p859_p13 = scmp.lt.s32.totalorder %s853_s24, %s853_s24 }
  0x1e   :  { %p860_p0 = por %p859_p13, %p858_p12 }
  0x20   :  { %p861_p1 = pnand %p860_p0, %p854_p11 }
  0x22   :  { %864 = shalt.err (!%p861_p1)
}
  0x23   :  { %s943_s1 = smov 128   ;;  %s944_s25 = smov 8  }
  0x24   :  { %27 = dma.hbm_to_vmem [thread:$0]  %s1118_s0, 256, %s22_s16, [#allocation3], %s943_s1, %s943_s1, %s944_s25  }
  0x25   :  { %s945_s28 = smov [#allocation7]   ;;  %s946_s30 = smov [#allocation8]  }
  0x26   :  { %s47_s29 = sshll.u32 %s945_s28, 4  ;;  %s61_s8 = sshll.u32 %s946_s30, 4  ;;  %s48_s29 = int_to_ptr.vmem [resolvable:$true] %s47_s29  ;;  %s1020_s8 = int_to_ptr.vmem [resolvable:$true] %s61_s8 }
  0x27   :  { %s865_s13 = scalar_lea.hbm %s1121_s3, 2048 }
  0x28   :  { %p866_p2 = scmp.ne.s32.totalorder %s1121_s3, %s865_s13  ;;  %p869_p3 = scmp.lt.u32.totalorder %s865_s13, %s1121_s3 }
  0x2a   :  { %p871_p4 = pnand %p869_p3, %p866_p2 }
  0x2c   :  { %874 = shalt.err (!%p871_p4)
}
  0x2d   :  { %s875_s0 = scalar_lea.vmem %s48_s29, 2048  ;;  %p880_p6 = scmp.lt.s32.totalorder %s48_s29, %s48_s29 }
  0x2e   :  { %p876_p5 = scmp.ne.s32.totalorder %s48_s29, %s875_s0  ;;  %p881_p7 = scmp.lt.s32.totalorder %s875_s0, %s875_s0 }
  0x30   :  { %p882_p8 = por %p881_p7, %p880_p6 }
  0x32   :  { %p883_p9 = pnand %p882_p8, %p876_p5 }
  0x34   :  { %886 = shalt.err (!%p883_p9)
}
  0x35   :  { %53 = dma.hbm_to_vmem [thread:$0]  %s1121_s3, 2048, %s48_s29, [#allocation6], %s940_s11, %s940_s11, %s941_s12  }
  0x36   :  { %s887_s22 = scalar_lea.hbm %s1123_s5, 1024 }
  0x37   :  { %p888_p10 = scmp.ne.s32.totalorder %s1123_s5, %s887_s22  ;;  %p891_p11 = scmp.lt.u32.totalorder %s887_s22, %s1123_s5 }
  0x39   :  { %p893_p12 = pnand %p891_p11, %p888_p10 }
  0x3b   :  { %896 = shalt.err (!%p893_p12)
}
  0x3c   :  { %s897_s28 = scalar_lea.vmem %s1020_s8, 1024  ;;  %p902_p0 = scmp.lt.s32.totalorder %s1020_s8, %s1020_s8 }
  0x3d   :  { %p898_p13 = scmp.ne.s32.totalorder %s1020_s8, %s897_s28  ;;  %p903_p1 = scmp.lt.s32.totalorder %s897_s28, %s897_s28 }
  0x3f   :  { %p904_p2 = por %p903_p1, %p902_p0 }
  0x41   :  { %p905_p3 = pnand %p904_p2, %p898_p13 }
  0x43   :  { %908 = shalt.err (!%p905_p3)
}
  0x44   :  { %67 = dma.hbm_to_vmem [thread:$0]  %s1123_s5, 1024, %s1020_s8, [#allocation9], %s940_s11, %s940_s11, %s941_s12  }
  0x45   :  { %931 = dma.done.wait [#allocation3], 256  }
  0x46   :  { %932 = vsyncadd [#allocation3], 4294967040 }
  0x47   :  { %933 = dma.done.wait [#allocation6], 2304  }
  0x48   :  { %934 = vsyncadd [#allocation6], 4294964992 }
  0x49   :  { %935 = dma.done.wait [#allocation9], 1024  }
  0x4a   :  { %936 = vsyncadd [#allocation9], 4294966272  ;;  %v947_v0 = vmov 0.0   ;;  %vm948_vm0 = vmmov 0   ;;  %v771_v1 = vld [vmem:[#allocation5] sm:$0xff]   ;;  %v772_v2 = vld [vmem:[#allocation5 + $0x8] sm:$0xff]  }
  0x4b   :  { %692 = vmatprep.subr.bf16.mxu0 %v947_v0  ;;  %696 = vmatprep.mubr.msk.bf16.mxu0 %vm948_vm0, %v947_v0  ;;  %v83_v3 = vld [vmem:[#allocation2] sm:$0xff]  ;;  %v84_v4 = vld [vmem:[#allocation2 + $0x8] sm:$0xff]  ;;  %vm109_vm1 = vcmask 261120   ;;  %v775_v17 = vld [vmem:[#allocation7 + $0x10] sm:$0xff]   ;;  %s949_s10 = smov [#allocation10]  }
  0x4c   :  { %700 = vmatprep.subr.bf16.mxu1 %v947_v0  ;;  %716 = vmatprep.mubr.msk.bf16.mxu1 %vm948_vm0, %v947_v0  ;;  %v90_v5 = vpack.c.bf16 %v84_v4, %v83_v3  ;;  %v630_v6 = vld [vmem:[%s1120_s2] ss:$0 sm:$0xff]  ;;  %v774_v16 = vld [vmem:[#allocation7 + $0x8] sm:$0xff]   ;;  %v776_v18 = vld [vmem:[#allocation7 + $0x18] sm:$0xff]   ;;  %s616_s13 = sshll.u32 %s949_s10, 4  ;;  %s617_s13 = int_to_ptr.vmem [resolvable:$true] %s616_s13 }
  0x4d   :  { %693 = vmatpush3.bf16.msra.mxu0 %v771_v1  ;;  %v773_v15 = vld [vmem:[#allocation7] sm:$0xff]   ;;  %v778_v20 = vld [vmem:[#allocation7 + $0x28] sm:$0xff]   ;;  %v779_v21 = vld [vmem:[#allocation7 + $0x30] sm:$0xff]   ;;  %s909_s14 = scalar_lea.vmem %s617_s13, 256  ;;  %p914_p5 = scmp.lt.s32.totalorder %s617_s13, %s617_s13 }
  0x4e   :  { %694 = vmatprep.subr.bf16.mxu0 %v947_v0  ;;  %701 = vmatpush3.bf16.msra.mxu1 %v773_v15  ;;  %v777_v19 = vld [vmem:[#allocation7 + $0x20] sm:$0xff]   ;;  %v780_v22 = vld [vmem:[#allocation7 + $0x38] sm:$0xff]   ;;  %v782_v3 = vld [vmem:[#allocation7 + $0x48] sm:$0xff]   ;;  %p910_p4 = scmp.ne.s32.totalorder %s617_s13, %s909_s14  ;;  %p915_p6 = scmp.lt.s32.totalorder %s909_s14, %s909_s14 }
  0x4f   :  { %702 = vmatprep.subr.bf16.mxu1 %v947_v0  ;;  %v634_v56 = vld [vmem:[%s1122_s4] ss:$0 sm:$0xff]  ;;  %v783_v4 = vld [vmem:[#allocation7 + $0x50] sm:$0xff]  }
  0x50   :  { %p916_p7 = por %p915_p6, %p914_p5 }
  0x51   :  { %695 = vmatpush3.bf16.msra.mxu0 %v772_v2  ;;  %v781_v2 = vld [vmem:[#allocation7 + $0x40] sm:$0xff]  }
  0x52   :  { %720 = vmatprep.subr.bf16.mxu0 %v947_v0  ;;  %703 = vmatpush3.bf16.msra.mxu1 %v774_v16  ;;  %p917_p8 = pnand %p916_p7, %p910_p4 }
  0x53   :  { %704 = vmatprep.subr.bf16.mxu1 %v947_v0 }
  0x54   :  { %697 = vmatmul.mubr.msk.bf16.vlgmr.msra.gmra.mrb[0].mxu0 %vm109_vm1, %v90_v5  ;;  %v784_v5 = vld [vmem:[#allocation7 + $0x58] sm:$0xff]  }
  0x55   :  { %736 = vmatprep.mubr.msk.bf16.mxu0 %vm948_vm0, %v947_v0  ;;  %721 = vmatpush3.bf16.msra.mxu0 %v781_v2 }
  0x56   :  { %705 = vmatpush3.bf16.msra.mxu1 %v775_v17  ;;  %722 = vmatprep.subr.bf16.mxu0 %v947_v0 }
  0x57   :  { %706 = vmatprep.subr.bf16.mxu1 %v947_v0 }
  0x59   :  { %723 = vmatpush3.bf16.msra.mxu0 %v782_v3 }
  0x5a   :  { %707 = vmatpush3.bf16.msra.mxu1 %v776_v18  ;;  %724 = vmatprep.subr.bf16.mxu0 %v947_v0 }
  0x5b   :  { %708 = vmatprep.subr.bf16.mxu1 %v947_v0 }
  0x5d   :  { %725 = vmatpush3.bf16.msra.mxu0 %v783_v4 }
  0x5e   :  { %709 = vmatpush3.bf16.msra.mxu1 %v777_v19  ;;  %726 = vmatprep.subr.bf16.mxu0 %v947_v0 }
  0x5f   :  { %710 = vmatprep.subr.bf16.mxu1 %v947_v0 }
  0x61   :  { %727 = vmatpush3.bf16.msra.mxu0 %v784_v5 }
  0x62   :  { %711 = vmatpush3.bf16.msra.mxu1 %v778_v20  ;;  %728 = vmatprep.subr.bf16.mxu0 %v947_v0 }
  0x63   :  { %712 = vmatprep.subr.bf16.mxu1 %v947_v0 }
  0x66   :  { %713 = vmatpush3.bf16.msra.mxu1 %v779_v21 }
  0x67   :  { %714 = vmatprep.subr.bf16.mxu1 %v947_v0 }
  0x6a   :  { %715 = vmatpush3.bf16.msra.mxu1 %v780_v22 }
  0x6b   :  { %740 = vmatprep.subr.bf16.mxu1 %v947_v0 }
 0x127   :  { %v147_v7 = vpop.f32.mrb[0].mxu0 }
 0x128   :  { %v148_v8 = vadd.f32 %v630_v6, %v147_v7  ;;  %v698_v9 = vpop.f32.mrb[1].mxu0  ;;  %v786_v7 = vld [vmem:[#allocation7 + $0x68] sm:$0xff]  }
 0x129   :  { %v150_v10 = vpop.f32.mrb[2].mxu0  ;;  %v788_v9 = vld [vmem:[#allocation7 + $0x78] sm:$0xff]  }
 0x12a   :  { %v151_v11 = vadd.f32 %v630_v6, %v150_v10  ;;  %154 = vadd.xlane.f32.xlu0 %v148_v8  ;;  %v699_v12 = vpop.f32.mrb[3].mxu0  ;;  %v158_v13 = vmul.f32 %v148_v8, %v148_v8  ;;  %v785_v6 = vld [vmem:[#allocation7 + $0x60] sm:$0xff]  }
 0x12b   :  { %729 = vmatpush3.bf16.msra.mxu0 %v785_v6 }
 0x12c   :  { %160 = vadd.xlane.f32.xlu1 %v158_v13  ;;  %v159_v14 = vmul.f32 %v151_v11, %v151_v11  ;;  %730 = vmatprep.subr.bf16.mxu0 %v947_v0 }
 0x12e   :  { %156 = vadd.xlane.f32.xlu0 %v151_v11 }
 0x12f   :  { %731 = vmatpush3.bf16.msra.mxu0 %v786_v7 }
 0x130   :  { %162 = vadd.xlane.f32.xlu1 %v159_v14  ;;  %732 = vmatprep.subr.bf16.mxu0 %v947_v0 }
 0x1b7   :  { %v155_v23 = vpop.xlane.xlu0 %154 }
 0x1b8   :  { %v164_v24 = vmul.f32 0.03125, %v155_v23 }
 0x1b9   :  { %v161_v25 = vpop.xlane.xlu1 %160 }
 0x1ba   :  { %v168_v26 = vmul.f32 %v164_v24, %v164_v24  ;;  %v166_v27 = vmul.f32 0.03125, %v161_v25  ;;  %v174_v39 = vsub.f32 %v148_v8, %v164_v24  ;;  %v787_v8 = vld [vmem:[#allocation7 + $0x70] sm:$0xff]  }
 0x1bb   :  { %v157_v28 = vpop.xlane.xlu0 %156  ;;  %733 = vmatpush3.bf16.msra.mxu0 %v787_v8 }
 0x1bc   :  { %v170_v29 = vsub.f32 %v166_v27, %v168_v26  ;;  %v165_v30 = vmul.f32 0.03125, %v157_v28  ;;  %734 = vmatprep.subr.bf16.mxu0 %v947_v0 }
 0x1bd   :  { %v163_v31 = vpop.xlane.xlu1 %162 }
 0x1be   :  { %v172_v32 = vmax.f32 %v170_v29, 0.0  ;;  %v169_v33 = vmul.f32 %v165_v30, %v165_v30  ;;  %v167_v34 = vmul.f32 0.03125, %v163_v31  ;;  %v175_v42 = vsub.f32 %v151_v11, %v165_v30 }
 0x1bf   :  { %735 = vmatpush3.bf16.msra.mxu0 %v788_v9 }
 0x1c0   :  { %v176_v35 = vadd.f32 1e-05, %v172_v32  ;;  %v171_v36 = vsub.f32 %v167_v34, %v169_v33 }
 0x1c2   :  { %797 = vrsqrt.f32 %v176_v35  ;;  %v173_v37 = vmax.f32 %v171_v36, 0.0 }
 0x1c4   :  { %v177_v38 = vadd.f32 1e-05, %v173_v37 }
 0x1c6   :  { %799 = vrsqrt.f32 %v177_v38 }
 0x1cc   :  { %v798_v40 = vpop.eup %797 }
 0x1cd   :  { %v180_v41 = vmul.f32 %v798_v40, %v174_v39 }
 0x1cf   :  { %v184_v43 = vmul.f32 0.70710677, %v180_v41  ;;  %v182_v50 = vmul.f32 0.5, %v180_v41 }
 0x1d0   :  { %v800_v44 = vpop.eup %799 }
 0x1d1   :  { %v181_v45 = vmul.f32 %v800_v44, %v175_v42  ;;  %801 = verf.f32 %v184_v43  ;;  %v644_v43 = vld [vmem:[%s1122_s4 + $0x1] ss:$0 sm:$0xff] }
 0x1d3   :  { %v185_v46 = vmul.f32 0.70710677, %v181_v45  ;;  %v183_v51 = vmul.f32 0.5, %v181_v45 }
 0x1d5   :  { %803 = verf.f32 %v185_v46 }
 0x1db   :  { %v802_v47 = vpop.eup %801 }
 0x1dc   :  { %v188_v48 = vadd.f32 1.0, %v802_v47 }
 0x1de   :  { %v190_v53 = vmul.f32 %v188_v48, %v182_v50 }
 0x1df   :  { %v804_v49 = vpop.eup %803 }
 0x1e0   :  { %v189_v52 = vadd.f32 1.0, %v804_v49 }
 0x1e2   :  { %v191_v54 = vmul.f32 %v189_v52, %v183_v51  ;;  %v789_v52 = vld [vmem:[#allocation8] sm:$0xff]  }
 0x1e4   :  { %v209_v55 = vpack.c.bf16 %v191_v54, %v190_v53  ;;  %v790_v53 = vld [vmem:[#allocation8 + $0x8] sm:$0xff]   ;;  %v791_v54 = vld [vmem:[#allocation8 + $0x10] sm:$0xff]  }
 0x1e6   :  { %717 = vmatmul.mubr.bf16.vlgmr.msra.gmra.mrb[0].mxu1 %v209_v55  ;;  %v792_v55 = vld [vmem:[#allocation8 + $0x18] sm:$0xff]  }
 0x1e7   :  { %756 = vmatprep.mubr.msk.bf16.mxu1 %vm948_vm0, %v947_v0  ;;  %741 = vmatpush3.bf16.msra.mxu1 %v789_v52 }
 0x1e8   :  { %742 = vmatprep.subr.bf16.mxu1 %v947_v0 }
 0x1eb   :  { %743 = vmatpush3.bf16.msra.mxu1 %v790_v53 }
 0x1ec   :  { %744 = vmatprep.subr.bf16.mxu1 %v947_v0 }
 0x1ef   :  { %745 = vmatpush3.bf16.msra.mxu1 %v791_v54 }
 0x1f0   :  { %746 = vmatprep.subr.bf16.mxu1 %v947_v0 }
 0x1f3   :  { %747 = vmatpush3.bf16.msra.mxu1 %v792_v55 }
 0x1f4   :  { %748 = vmatprep.subr.bf16.mxu1 %v947_v0 }
 0x2b9   :  { %v298_v57 = vpop.f32.mrb[0].mxu1 }
 0x2ba   :  { %v299_v58 = vadd.f32 %v634_v56, %v298_v57  ;;  %v718_v59 = vpop.f32.mrb[1].mxu1  ;;  %v794_v57 = vld [vmem:[#allocation8 + $0x28] sm:$0xff]  }
 0x2bb   :  { %v301_v60 = vpop.f32.mrb[2].mxu1  ;;  %v796_v59 = vld [vmem:[#allocation8 + $0x38] sm:$0xff]  }
 0x2bc   :  { %v302_v61 = vadd.f32 %v634_v56, %v301_v60  ;;  %305 = vadd.xlane.f32.xlu0 %v299_v58  ;;  %v719_v62 = vpop.f32.mrb[3].mxu1  ;;  %v309_v63 = vmul.f32 %v299_v58, %v299_v58  ;;  %v793_v56 = vld [vmem:[#allocation8 + $0x20] sm:$0xff]  }
 0x2bd   :  { %749 = vmatpush3.bf16.msra.mxu1 %v793_v56 }
 0x2be   :  { %307 = vadd.xlane.f32.xlu1 %v302_v61  ;;  %v310_v1 = vmul.f32 %v302_v61, %v302_v61  ;;  %750 = vmatprep.subr.bf16.mxu1 %v947_v0 }
 0x2c0   :  { %311 = vadd.xlane.f32.xlu0 %v309_v63 }
 0x2c1   :  { %751 = vmatpush3.bf16.msra.mxu1 %v794_v57 }
 0x2c2   :  { %313 = vadd.xlane.f32.xlu1 %v310_v1  ;;  %752 = vmatprep.subr.bf16.mxu1 %v947_v0 }
 0x349   :  { %v306_v10 = vpop.xlane.xlu0 %305 }
 0x34a   :  { %v315_v11 = vmul.f32 0.03125, %v306_v10 }
 0x34b   :  { %v308_v12 = vpop.xlane.xlu1 %307 }
 0x34c   :  { %v316_v13 = vmul.f32 0.03125, %v308_v12  ;;  %v319_v15 = vmul.f32 %v315_v11, %v315_v11  ;;  %v325_v26 = vsub.f32 %v299_v58, %v315_v11  ;;  %v795_v58 = vld [vmem:[#allocation8 + $0x30] sm:$0xff]  }
 0x34d   :  { %v312_v14 = vpop.xlane.xlu0 %311  ;;  %753 = vmatpush3.bf16.msra.mxu1 %v795_v58 }
 0x34e   :  { %v317_v16 = vmul.f32 0.03125, %v312_v14  ;;  %v320_v18 = vmul.f32 %v316_v13, %v316_v13  ;;  %v326_v28 = vsub.f32 %v302_v61, %v316_v13  ;;  %754 = vmatprep.subr.bf16.mxu1 %v947_v0 }
 0x34f   :  { %v314_v17 = vpop.xlane.xlu1 %313 }
 0x350   :  { %v321_v19 = vsub.f32 %v317_v16, %v319_v15  ;;  %v318_v20 = vmul.f32 0.03125, %v314_v17 }
 0x351   :  { %755 = vmatpush3.bf16.msra.mxu1 %v796_v59 }
 0x352   :  { %v323_v21 = vmax.f32 %v321_v19, 0.0  ;;  %v322_v22 = vsub.f32 %v318_v20, %v320_v18 }
 0x354   :  { %v327_v23 = vadd.f32 1e-05, %v323_v21  ;;  %v324_v24 = vmax.f32 %v322_v22, 0.0 }
 0x356   :  { %805 = vrsqrt.f32 %v327_v23  ;;  %v328_v25 = vadd.f32 1e-05, %v324_v24 }
 0x358   :  { %807 = vrsqrt.f32 %v328_v25 }
 0x360   :  { %v806_v27 = vpop.eup %805 }
 0x361   :  { %v331_v29 = vmul.f32 %v806_v27, %v325_v26 }
 0x362   :  { %v808_v30 = vpop.eup %807 }
 0x363   :  { %v332_v31 = vmul.f32 %v808_v30, %v326_v28  ;;  %v335_v32 = vmul.f32 0.70710677, %v331_v29  ;;  %v333_v37 = vmul.f32 0.5, %v331_v29  ;;  %v653_v29 = vld [vmem:[%s1124_s6] ss:$0 sm:$0xff] }
 0x365   :  { %v336_v33 = vmul.f32 0.70710677, %v332_v31  ;;  %809 = verf.f32 %v335_v32  ;;  %v334_v38 = vmul.f32 0.5, %v332_v31 }
 0x367   :  { %811 = verf.f32 %v336_v33 }
 0x36f   :  { %v810_v34 = vpop.eup %809 }
 0x370   :  { %v339_v35 = vadd.f32 1.0, %v810_v34 }
 0x371   :  { %v812_v36 = vpop.eup %811 }
 0x372   :  { %v340_v39 = vadd.f32 1.0, %v812_v36  ;;  %v341_v40 = vmul.f32 %v339_v35, %v333_v37 }
 0x374   :  { %v342_v41 = vmul.f32 %v340_v39, %v334_v38 }
 0x376   :  { %v362_v42 = vpack.c.bf16 %v342_v41, %v341_v40 }
 0x378   :  { %737 = vmatmul.mubr.bf16.vlgmr.msra.gmra.mrb[4].mxu0 %v362_v42 }
 0x44b   :  { %v451_v44 = vpop.f32.mrb[4].mxu0 }
 0x44c   :  { %v452_v45 = vadd.f32 %v644_v43, %v451_v44  ;;  %v738_v46 = vpop.f32.mrb[5].mxu0 }
 0x44d   :  { %v454_v47 = vpop.f32.mrb[6].mxu0 }
 0x44e   :  { %v455_v48 = vadd.f32 %v644_v43, %v454_v47  ;;  %458 = vadd.xlane.f32.xlu0 %v452_v45  ;;  %v739_v49 = vpop.f32.mrb[7].mxu0  ;;  %v462_v50 = vmul.f32 %v452_v45, %v452_v45 }
 0x450   :  { %460 = vadd.xlane.f32.xlu1 %v455_v48  ;;  %v463_v51 = vmul.f32 %v455_v48, %v455_v48 }
 0x452   :  { %464 = vadd.xlane.f32.xlu0 %v462_v50 }
 0x454   :  { %466 = vadd.xlane.f32.xlu1 %v463_v51 }
 0x4db   :  { %v459_v60 = vpop.xlane.xlu0 %458 }
 0x4dc   :  { %v468_v61 = vmul.f32 0.03125, %v459_v60 }
 0x4dd   :  { %v461_v62 = vpop.xlane.xlu1 %460 }
 0x4de   :  { %v469_v63 = vmul.f32 0.03125, %v461_v62  ;;  %v472_v2 = vmul.f32 %v468_v61, %v468_v61  ;;  %v478_v0 = vsub.f32 %v452_v45, %v468_v61 }
 0x4df   :  { %v465_v1 = vpop.xlane.xlu0 %464 }
 0x4e0   :  { %v470_v3 = vmul.f32 0.03125, %v465_v1  ;;  %v473_v5 = vmul.f32 %v469_v63, %v469_v63  ;;  %v479_v14 = vsub.f32 %v455_v48, %v469_v63 }
 0x4e1   :  { %v467_v4 = vpop.xlane.xlu1 %466 }
 0x4e2   :  { %v474_v6 = vsub.f32 %v470_v3, %v472_v2  ;;  %v471_v7 = vmul.f32 0.03125, %v467_v4 }
 0x4e4   :  { %v476_v8 = vmax.f32 %v474_v6, 0.0  ;;  %v475_v9 = vsub.f32 %v471_v7, %v473_v5 }
 0x4e6   :  { %v480_v10 = vadd.f32 1e-05, %v476_v8  ;;  %v477_v11 = vmax.f32 %v475_v9, 0.0 }
 0x4e8   :  { %813 = vrsqrt.f32 %v480_v10  ;;  %v481_v12 = vadd.f32 1e-05, %v477_v11 }
 0x4ea   :  { %815 = vrsqrt.f32 %v481_v12 }
 0x4f2   :  { %v814_v13 = vpop.eup %813 }
 0x4f3   :  { %v484_v15 = vmul.f32 %v814_v13, %v478_v0 }
 0x4f4   :  { %v816_v16 = vpop.eup %815 }
 0x4f5   :  { %v485_v17 = vmul.f32 %v816_v16, %v479_v14  ;;  %v488_v18 = vmul.f32 0.70710677, %v484_v15  ;;  %v486_v23 = vmul.f32 0.5, %v484_v15 }
 0x4f7   :  { %v489_v19 = vmul.f32 0.70710677, %v485_v17  ;;  %817 = verf.f32 %v488_v18  ;;  %v487_v24 = vmul.f32 0.5, %v485_v17 }
 0x4f9   :  { %819 = verf.f32 %v489_v19 }
 0x501   :  { %v818_v20 = vpop.eup %817 }
 0x502   :  { %v492_v21 = vadd.f32 1.0, %v818_v20 }
 0x503   :  { %v820_v22 = vpop.eup %819 }
 0x504   :  { %v493_v25 = vadd.f32 1.0, %v820_v22  ;;  %v494_v26 = vmul.f32 %v492_v21, %v486_v23 }
 0x506   :  { %v495_v27 = vmul.f32 %v493_v25, %v487_v24 }
 0x508   :  { %v496_v28 = vpack.c.bf16 %v495_v27, %v494_v26 }
 0x50a   :  { %757 = vmatmul.mubr.bf16.vlgmr.msra.gmra.mrb[4].mxu1 %v496_v28 }
 0x5dd   :  { %v602_v30 = vpop.f32.mrb[4].mxu1 }
 0x5de   :  { %v603_v31 = vadd.f32 %v653_v29, %v602_v30  ;;  %v758_v32 = vpop.f32.mrb[5].mxu1 }
 0x5df   :  { %v605_v33 = vpop.f32.mrb[6].mxu1 }
 0x5e0   :  { %609 = vst [vmem:[#allocation10] sm:$0xff] %v603_v31  ;;  %v606_v34 = vadd.f32 %v653_v29, %v605_v33  ;;  %v759_v35 = vpop.f32.mrb[7].mxu1 }
 0x5e2   :  { %610 = vst [vmem:[#allocation10 + $0x8] sm:$0xff] %v606_v34 }
 0x5e3   :  { %920 = shalt.err (!%p917_p8)
}
 0x5e4   :  { %s921_s17 = scalar_lea.hbm %s1125_s7, 256 }
 0x5e5   :  { %p922_p9 = scmp.ne.s32.totalorder %s1125_s7, %s921_s17  ;;  %p925_p10 = scmp.lt.u32.totalorder %s921_s17, %s1125_s7 }
 0x5e7   :  { %p927_p11 = pnand %p925_p10, %p922_p9 }
 0x5e9   :  { %930 = shalt.err (!%p927_p11)
}
 0x5ea   :  { %622 = dma.vmem_to_hbm [thread:$0]  %s617_s13, 256, %s1125_s7, [#allocation4], %s943_s1, %s943_s1, %s944_s25  }
 0x5eb   :  { %937 = dma.done.wait [#allocation4], 256  }
 0x5ec   :  { %938 = vsyncadd [#allocation4], 4294967040 }
 0x5ed   :  { %626 = vsyncpa [#allocation3], 1 }
 0x5ee   :  { %627 = vsyncpa [#allocation6], 1 }
 0x5ef   :  { %628 = vsyncpa [#allocation9], 1 }
 0x5f0   :  { %629 = vsyncpa [#allocation4], 1 }

</bundles_post_ra>
